<compile_context>
chip_gen: v6e
topology: v6e:2x2x1
jax: 0.10.0
libtpu: 0.0.40
codegen_flags: <defaults>
</compile_context>

<pallas_src>
import functools

import jax
import jax.numpy as jnp
from jax.experimental import pallas as pl
from jax.experimental.pallas import tpu as pltpu


def _round_up(x: int, m: int) -> int:
    return (x + m - 1) // m * m


def _make_clinical_ffn_kernel(has_num: bool, n_cat: int, cat_offsets,
                              eps: float = 1e-5):
    """Fused [one-hot select -> block-diag emb matmul -> BN(train) -> ReLU -> Linear(+bias)].

    Ref order: [num_sel?] [cat_idx?] S gb w_aug | out
    All refs are whole-array VMEM residents (gridless pallas_call).
    """

    def kernel(*refs):
        pos = 0
        num_ref = None
        idx_ref = None
        if has_num:
            num_ref = refs[pos]
            pos += 1
        if n_cat > 0:
            idx_ref = refs[pos]
            pos += 1
        s_ref, gb_ref, w_ref, o_ref = refs[pos:]

        batch = o_ref.shape[0]
        ksel = s_ref.shape[0]

        # --- Combined selector U (B, K_sel_pad) -------------------------------
        # Numerical values already sit in the first n_num lanes (host-packed);
        # each categorical column contributes a one-hot in its disjoint
        # stacked-vocab lane range [offset_k, offset_k + V_k).
        if has_num:
            u = num_ref[...]
        else:
            u = jnp.zeros((batch, ksel), jnp.float32)
        if n_cat > 0:
            idx = idx_ref[...]                                        # (B, n_cat) i32
            iota = jax.lax.broadcasted_iota(jnp.int32, (batch, ksel), 1)
            for k in range(n_cat):
                u = u + (iota == (idx[:, k:k + 1] + cat_offsets[k])).astype(jnp.float32)

        # --- Single block-diagonal matmul: gather + concat + pad in one shot ---
        x = jnp.dot(u, s_ref[...], preferred_element_type=jnp.float32)  # (B, C_in_pad)

        # --- BatchNorm1d (training mode), two-pass centered variance ----------
        inv_b = 1.0 / batch
        mean = jnp.sum(x, axis=0, keepdims=True) * inv_b                 # (1, C)
        centered = x - mean
        var = jnp.sum(centered * centered, axis=0, keepdims=True) * inv_b
        gb = gb_ref[...]                                                 # (2, C)
        scale = jax.lax.rsqrt(var + eps) * gb[0:1, :]
        shift = gb[1:2, :] - mean * scale
        # Pad channels: x==0, beta==0 -> h==0 (weight rows are zero).
        # Bias channel: x==0, beta==1 -> h==1 (its weight row is the Linear bias),
        # so the bias add comes out of the same matmul below, exactly.
        h = jnp.maximum(x * scale + shift, 0.0)                          # ReLU

        # --- Linear (bias folded), lane-dense output store ---------------------
        o_ref[...] = jnp.dot(h, w_ref[...], preferred_element_type=jnp.float32)

    return kernel


def clinical_ffn_forward(num_sel, cat_idx, *, s_mat, gb, w_aug,
                         has_num, n_cat, cat_offsets, out_channels):
    """num_sel: (B, K_sel_pad) f32 or None; cat_idx: (B, n_cat) i32 or None."""
    batch = num_sel.shape[0] if num_sel is not None else cat_idx.shape[0]
    c_out_pad = w_aug.shape[1]

    args = []
    if has_num:
        args.append(num_sel)
    if n_cat > 0:
        args.append(cat_idx)
    args.extend([s_mat, gb, w_aug])

    out_pad = pl.pallas_call(
        _make_clinical_ffn_kernel(has_num, n_cat, cat_offsets),
        out_shape=jax.ShapeDtypeStruct((batch, c_out_pad), jnp.float32),
        in_specs=[pl.BlockSpec(memory_space=pltpu.MemorySpace.VMEM)
                  for _ in args],
        out_specs=pl.BlockSpec(memory_space=pltpu.MemorySpace.VMEM),
        compiler_params=pltpu.CompilerParams(vmem_limit_bytes=32 * 1024 * 1024),
    )(*args)
    return out_pad[:, :out_channels]


class ClinicalFFNPallas:
    """JAX/Pallas port of ClinicalFFN with deterministic synthetic parameters."""

    def __init__(self, numerical_cols, categorical_col_maps, embedding_dim,
                 out_channels, key):
        self.numerical_cols = list(numerical_cols)
        self.categorical_col_maps = dict(categorical_col_maps)
        self.embedding_dim = embedding_dim
        self.out_channels = out_channels
        self.has_cat = len(self.categorical_col_maps) > 0
        self.has_num = len(self.numerical_cols) > 0

        n_num = len(self.numerical_cols)
        n_cat = len(self.categorical_col_maps)
        vocabs = list(self.categorical_col_maps.values())
        self.encoder_in_channels = n_num + n_cat * embedding_dim
        c_in = self.encoder_in_channels

        # Padded geometry.  +1 reserves a pad channel used to fold the Linear bias.
        self.c_in_pad = _round_up(c_in + 1, 8)
        self.bias_channel = self.c_in_pad - 1
        self.c_out_pad = _round_up(max(out_channels, 1), 128)   # lane-dense out store
        k_sel = n_num + sum(vocabs)
        self.k_sel_pad = _round_up(max(k_sel, 1), 8)

        # Stacked-vocab lane offsets for each categorical column.
        offs, acc = [], n_num
        for v in vocabs:
            offs.append(acc)
            acc += v
        self.cat_offsets = tuple(offs)

        keys = jax.random.split(key, n_cat + 2)
        # Embedding tables: N(0, 1), matching nn.Embedding default init.
        self.embs = {}
        for i, (name, n_vocab) in enumerate(self.categorical_col_maps.items()):
            self.embs[name] = jax.random.normal(
                keys[i], (n_vocab, embedding_dim), dtype=jnp.float32)

        # BatchNorm1d affine (default init); reference copies.
        self.gamma = jnp.ones((1, c_in), dtype=jnp.float32)
        self.beta = jnp.zeros((1, c_in), dtype=jnp.float32)
        # Fused gamma/beta ref: row 0 = gamma (pad=1), row 1 = beta (pad=0, bias ch=1).
        gb = jnp.zeros((2, self.c_in_pad), dtype=jnp.float32)
        gb = gb.at[0, :].set(1.0)
        gb = gb.at[1, self.bias_channel].set(1.0)
        self.gb = gb

        # Linear(c_in -> out_channels): U(-1/sqrt(c_in), 1/sqrt(c_in)).
        bound = 1.0 / (c_in ** 0.5)
        w = jax.random.uniform(keys[-2], (out_channels, c_in),
                               minval=-bound, maxval=bound, dtype=jnp.float32)
        b = jax.random.uniform(keys[-1], (1, out_channels),
                               minval=-bound, maxval=bound, dtype=jnp.float32)
        self.w_t = jnp.transpose(w)                      # (C_in, C_out), reference
        self.bias = b                                    # (1, C_out), reference

        # Pre-packed block-diagonal selection/embedding matrix S.
        s = jnp.zeros((self.k_sel_pad, self.c_in_pad), dtype=jnp.float32)
        if n_num > 0:
            s = s.at[jnp.arange(n_num), jnp.arange(n_num)].set(1.0)
        row = n_num
        for k, name in enumerate(self.categorical_col_maps):
            v = self.categorical_col_maps[name]
            col = n_num + k * embedding_dim
            s = s.at[row:row + v, col:col + embedding_dim].set(self.embs[name])
            row += v
        self.s_mat = s

        # Pre-packed weight with bias folded into the bias channel's row.
        w_aug = jnp.zeros((self.c_in_pad, self.c_out_pad), dtype=jnp.float32)
        w_aug = w_aug.at[:c_in, :out_channels].set(self.w_t)
        w_aug = w_aug.at[self.bias_channel, :out_channels].set(self.bias[0])
        self.w_aug = w_aug

        self._jit_forward = jax.jit(functools.partial(
            clinical_ffn_forward,
            s_mat=self.s_mat,
            gb=self.gb,
            w_aug=self.w_aug,
            has_num=self.has_num,
            n_cat=n_cat,
            cat_offsets=self.cat_offsets,
            out_channels=self.out_channels,
        ))

    def _pack_inputs(self, x):
        """Host-side: convert the PyTorch-style list-of-dicts to dense arrays."""
        num_mat = None
        cat_idx = None
        if self.has_num:
            num_mat = jnp.stack(
                [jnp.asarray(x_i["num"], dtype=jnp.float32) for x_i in x], axis=0)
        if self.has_cat:
            cols = [
                jnp.stack([jnp.asarray(x_i["cat"][name]) for x_i in x], axis=0)
                for name in self.categorical_col_maps
            ]
            cat_idx = jnp.stack(cols, axis=1).astype(jnp.int32)      # (B, n_cat)
        return num_mat, cat_idx

    def __call__(self, x):
        num_mat, cat_idx = self._pack_inputs(x)
        num_sel = None
        if self.has_num:
            # Numerical values occupy the first n_num lanes of the selector ref.
            n_num = len(self.numerical_cols)
            num_sel = jnp.zeros((num_mat.shape[0], self.k_sel_pad), jnp.float32)
            num_sel = num_sel.at[:, :n_num].set(num_mat)
        return self._jit_forward(num_sel, cat_idx)

    # Pure-JAX reference (unpadded) for correctness checking.
    def reference(self, x):
        num_mat, cat_idx = self._pack_inputs(x)
        parts = []
        if self.has_num:
            parts.append(num_mat)
        if self.has_cat:
            for k, name in enumerate(self.categorical_col_maps):
                parts.append(jnp.take(self.embs[name], cat_idx[:, k], axis=0))
        t = jnp.concatenate(parts, axis=1)
        mean = jnp.mean(t, axis=0, keepdims=True)
        var = jnp.mean((t - mean) ** 2, axis=0, keepdims=True)
        h = (t - mean) * jax.lax.rsqrt(var + 1e-5) * self.gamma + self.beta
        h = jnp.maximum(h, 0.0)
        return h @ self.w_t + self.bias


if __name__ == "__main__":
    key = jax.random.PRNGKey(0)
    k_model, k_num, k_cat = jax.random.split(key, 3)

    numerical_cols = ["age", "bmi", "sbp", "hr"]                 # 4 numerical cols
    categorical_col_maps = {"sex": 2, "site": 5, "stage": 4}     # 3 categorical cols
    embedding_dim = 8
    out_channels = 32
    B = 8

    model = ClinicalFFNPallas(
        numerical_cols, categorical_col_maps, embedding_dim, out_channels, k_model
    )

    # Build the list-of-dicts input the PyTorch module expects.
    num_mat = jax.random.normal(k_num, (B, len(numerical_cols)), dtype=jnp.float32)
    cat_keys = jax.random.split(k_cat, len(categorical_col_maps))
    cat_mat = {
        name: jax.random.randint(ck, (B,), 0, n, dtype=jnp.int32)
        for ck, (name, n) in zip(cat_keys, categorical_col_maps.items())
    }
    x = [
        {
            "num": num_mat[i],
            "cat": {name: cat_mat[name][i] for name in categorical_col_maps},
        }
        for i in range(B)
    ]

    out = jax.block_until_ready(model(x))
    ref = model.reference(x)

    assert out.shape == (B, out_channels)
    assert jnp.allclose(out, ref, atol=1e-4, rtol=1e-4)

    print("KERNEL_OK")
</pallas_src>

<mosaic_0001>
module attributes {stable_mosaic.version = 11 : i64} {
  func.func @kernel(%arg0: memref<8x16xf32, #tpu.memory_space<vmem>>, %arg1: memref<8x3xi32, #tpu.memory_space<vmem>>, %arg2: memref<16x32xf32, #tpu.memory_space<vmem>>, %arg3: memref<2x32xf32, #tpu.memory_space<vmem>>, %arg4: memref<32x128xf32, #tpu.memory_space<vmem>>, %arg5: memref<8x128xf32, #tpu.memory_space<vmem>>) attributes {dimension_semantics = [], scalar_prefetch = 0 : i64, scratch_operands = 0 : i64, tpu.core_type = #tpu.core_type<tc>} {
    %c0 = arith.constant 0 : index
    %c0_0 = arith.constant 0 : index
    %0 = vector.load %arg0[%c0, %c0_0] : memref<8x16xf32, #tpu.memory_space<vmem>>, vector<8x16xf32>
    %c0_1 = arith.constant 0 : index
    %c0_2 = arith.constant 0 : index
    %1 = vector.load %arg1[%c0_1, %c0_2] : memref<8x3xi32, #tpu.memory_space<vmem>>, vector<8x3xi32>
    %2 = tpu.iota {dimensions = array<i32: 1>} : vector<8x16xi32>
    %3 = vector.extract_strided_slice %1 {offsets = [0, 0], sizes = [8, 1], strides = [1, 1]} : vector<8x3xi32> to vector<8x1xi32>
    %c4_i32 = arith.constant 4 : i32
    %4 = vector.broadcast %c4_i32 : i32 to vector<8x1xi32>
    %5 = arith.addi %3, %4 : vector<8x1xi32>
    %6 = vector.broadcast %5 : vector<8x1xi32> to vector<8x16xi32>
    %7 = arith.cmpi eq, %2, %6 : vector<8x16xi32>
    %8 = arith.extui %7 : vector<8x16xi1> to vector<8x16xi32>
    %9 = arith.sitofp %8 : vector<8x16xi32> to vector<8x16xf32>
    %10 = arith.addf %0, %9 : vector<8x16xf32>
    %11 = vector.extract_strided_slice %1 {offsets = [0, 1], sizes = [8, 1], strides = [1, 1]} : vector<8x3xi32> to vector<8x1xi32>
    %c6_i32 = arith.constant 6 : i32
    %12 = vector.broadcast %c6_i32 : i32 to vector<8x1xi32>
    %13 = arith.addi %11, %12 : vector<8x1xi32>
    %14 = vector.broadcast %13 : vector<8x1xi32> to vector<8x16xi32>
    %15 = arith.cmpi eq, %2, %14 : vector<8x16xi32>
    %16 = arith.extui %15 : vector<8x16xi1> to vector<8x16xi32>
    %17 = arith.sitofp %16 : vector<8x16xi32> to vector<8x16xf32>
    %18 = arith.addf %10, %17 : vector<8x16xf32>
    %19 = vector.extract_strided_slice %1 {offsets = [0, 2], sizes = [8, 1], strides = [1, 1]} : vector<8x3xi32> to vector<8x1xi32>
    %c11_i32 = arith.constant 11 : i32
    %20 = vector.broadcast %c11_i32 : i32 to vector<8x1xi32>
    %21 = arith.addi %19, %20 : vector<8x1xi32>
    %22 = vector.broadcast %21 : vector<8x1xi32> to vector<8x16xi32>
    %23 = arith.cmpi eq, %2, %22 : vector<8x16xi32>
    %24 = arith.extui %23 : vector<8x16xi1> to vector<8x16xi32>
    %25 = arith.sitofp %24 : vector<8x16xi32> to vector<8x16xf32>
    %26 = arith.addf %18, %25 : vector<8x16xf32>
    %c0_3 = arith.constant 0 : index
    %c0_4 = arith.constant 0 : index
    %27 = vector.load %arg2[%c0_3, %c0_4] : memref<16x32xf32, #tpu.memory_space<vmem>>, vector<16x32xf32>
    %cst = arith.constant dense<0.000000e+00> : vector<8x32xf32>
    %28 = tpu.matmul %26, %27, %cst {dimension_numbers = #tpu.dot_dimension_numbers<[1], [0], [0], [1], [0, 0, 1, 1], [], []>} : vector<8x16xf32>, vector<16x32xf32>, vector<8x32xf32> -> vector<8x32xf32>
    %cst_5 = arith.constant dense<0.000000e+00> : vector<32xf32>
    %29 = vector.multi_reduction <add>, %28, %cst_5 [0] : vector<8x32xf32> to vector<32xf32>
    %30 = vector.shape_cast %29 : vector<32xf32> to vector<1x32xf32>
    %cst_6 = arith.constant 1.250000e-01 : f32
    %31 = vector.broadcast %cst_6 : f32 to vector<1x32xf32>
    %32 = arith.mulf %30, %31 : vector<1x32xf32>
    %33 = vector.broadcast %32 : vector<1x32xf32> to vector<8x32xf32>
    %34 = arith.subf %28, %33 : vector<8x32xf32>
    %35 = arith.mulf %34, %34 : vector<8x32xf32>
    %cst_7 = arith.constant dense<0.000000e+00> : vector<32xf32>
    %36 = vector.multi_reduction <add>, %35, %cst_7 [0] : vector<8x32xf32> to vector<32xf32>
    %37 = vector.shape_cast %36 : vector<32xf32> to vector<1x32xf32>
    %cst_8 = arith.constant 1.250000e-01 : f32
    %38 = vector.broadcast %cst_8 : f32 to vector<1x32xf32>
    %39 = arith.mulf %37, %38 : vector<1x32xf32>
    %c0_9 = arith.constant 0 : index
    %c0_10 = arith.constant 0 : index
    %40 = vector.load %arg3[%c0_9, %c0_10] : memref<2x32xf32, #tpu.memory_space<vmem>>, vector<2x32xf32>
    %cst_11 = arith.constant 9.99999974E-6 : f32
    %41 = vector.broadcast %cst_11 : f32 to vector<1x32xf32>
    %42 = arith.addf %39, %41 : vector<1x32xf32>
    %43 = math.rsqrt %42 : vector<1x32xf32>
    %44 = vector.extract_strided_slice %40 {offsets = [0, 0], sizes = [1, 32], strides = [1, 1]} : vector<2x32xf32> to vector<1x32xf32>
    %45 = arith.mulf %43, %44 : vector<1x32xf32>
    %46 = vector.extract_strided_slice %40 {offsets = [1, 0], sizes = [1, 32], strides = [1, 1]} : vector<2x32xf32> to vector<1x32xf32>
    %47 = arith.mulf %32, %45 : vector<1x32xf32>
    %48 = arith.subf %46, %47 : vector<1x32xf32>
    %49 = vector.broadcast %45 : vector<1x32xf32> to vector<8x32xf32>
    %50 = arith.mulf %28, %49 : vector<8x32xf32>
    %51 = vector.broadcast %48 : vector<1x32xf32> to vector<8x32xf32>
    %52 = arith.addf %50, %51 : vector<8x32xf32>
    %cst_12 = arith.constant 0.000000e+00 : f32
    %53 = vector.broadcast %cst_12 : f32 to vector<8x32xf32>
    %54 = arith.maximumf %52, %53 : vector<8x32xf32>
    %c0_13 = arith.constant 0 : index
    %c0_14 = arith.constant 0 : index
    %55 = vector.load %arg4[%c0_13, %c0_14] : memref<32x128xf32, #tpu.memory_space<vmem>>, vector<32x128xf32>
    %cst_15 = arith.constant dense<0.000000e+00> : vector<8x128xf32>
    %56 = tpu.matmul %54, %55, %cst_15 {dimension_numbers = #tpu.dot_dimension_numbers<[1], [0], [0], [1], [0, 0, 1, 1], [], []>} : vector<8x32xf32>, vector<32x128xf32>, vector<8x128xf32> -> vector<8x128xf32>
    %c0_16 = arith.constant 0 : index
    %c0_17 = arith.constant 0 : index
    %57 = vector.load %arg5[%c0_16, %c0_17] : memref<8x128xf32, #tpu.memory_space<vmem>>, vector<8x128xf32>
    tpu.vector_store %arg5[%c0_16, %c0_17], %56 {strides = array<i32>} : memref<8x128xf32, #tpu.memory_space<vmem>>, vector<8x128xf32>,
    return
  }
}

</mosaic_0001>

<bundles_post_ra>
// kernel: clinical_ffn_forward.1
= control target key start
LH: loop header
LB: loop body
LE: loop exit
PB: predicated region body
PF: predicated region fallthrough
CT: control target
= control target key end

     0   :  { %10 = vsyncpa [#allocation3], 0  ;;  %s460_s0 = inlined_call_operand.vmem [shape: f32[8,16], index: 0, kind: input, shape index: {}]   ;;  %s461_s1 = inlined_call_operand.vmem [shape: s32[8,3], index: 1, kind: input, shape index: {}]   ;;  %s462_s2 = inlined_call_operand.hbm [shape: f32[16,32], index: 2, kind: input, shape index: {}]   ;;  %s463_s3 = inlined_call_operand.vmem [shape: f32[2,32], index: 3, kind: input, shape index: {}]   ;;  %s464_s4 = inlined_call_operand.hbm [shape: f32[32,128], index: 4, kind: input, shape index: {}]   ;;  %s465_s5 = inlined_call_operand.hbm [shape: f32[8,128], index: 5, kind: output, shape index: {}]  }
   0x1   :  { %11 = vsyncpa [#allocation6], 0 }
   0x2   :  { %12 = vsyncpa [#allocation4], 0  ;;  %s399_s18 = smov [#allocation2]  }
   0x3   :  { %s22_s19 = sshll.u32 %s399_s18, 4  ;;  %s23_s19 = int_to_ptr.vmem [resolvable:$true] %s22_s19 }
   0x4   :  { %s341_s20 = scalar_lea.vmem %s23_s19, 256  ;;  %p346_p1 = scmp.lt.s32.totalorder %s23_s19, %s23_s19 }
   0x5   :  { %p342_p0 = scmp.ne.s32.totalorder %s23_s19, %s341_s20  ;;  %p347_p2 = scmp.lt.s32.totalorder %s341_s20, %s341_s20 }
   0x7   :  { %p348_p3 = por %p347_p2, %p346_p1 }
   0x9   :  { %p349_p4 = pnand %p348_p3, %p342_p0 }
   0xb   :  { %352 = shalt.err (!%p349_p4)
}
   0xc   :  { %s400_s21 = smov 128   ;;  %s401_s22 = smov 8  }
   0xd   :  { %28 = dma.hbm_to_vmem [thread:$0]  %s462_s2, 256, %s23_s19, [#allocation3], %s400_s21, %s400_s21, %s401_s22  }
   0xe   :  { %s402_s25 = smov [#allocation5]  }
   0xf   :  { %s36_s26 = sshll.u32 %s402_s25, 4  ;;  %s37_s26 = int_to_ptr.vmem [resolvable:$true] %s36_s26 }
  0x10   :  { %s361_s27 = scalar_lea.vmem %s37_s26, 512  ;;  %p366_p6 = scmp.lt.s32.totalorder %s37_s26, %s37_s26 }
  0x11   :  { %p362_p5 = scmp.ne.s32.totalorder %s37_s26, %s361_s27  ;;  %p367_p7 = scmp.lt.s32.totalorder %s361_s27, %s361_s27 }
  0x13   :  { %p368_p8 = por %p367_p7, %p366_p6 }
  0x15   :  { %p369_p9 = pnand %p368_p8, %p362_p5 }
  0x17   :  { %372 = shalt.err (!%p369_p9)
}
  0x18   :  { %42 = dma.hbm_to_vmem [thread:$0]  %s464_s4, 512, %s37_s26, [#allocation6], %s400_s21, %s400_s21, %s401_s22  }
  0x19   :  { %393 = dma.done.wait [#allocation3], 256  }
  0x1a   :  { %394 = vsyncadd [#allocation3], 4294967040 }
  0x1b   :  { %395 = dma.done.wait [#allocation6], 512  }
  0x1c   :  { %396 = vsyncadd [#allocation6], 4294966784  ;;  %v403_v0 = vmov 0   ;;  %v404_v1 = vmov 2   ;;  %v405_v2 = vmov 0.0   ;;  %v50_v3 = vld [vmem:[%s461_s1] sm:$0xff]  ;;  %v51_v10 = vlaneseq }
  0x1d   :  { %327 = vset.pattern.permute.xlu0 %v403_v0  ;;  %329 = vset.pattern.permute.xlu1 %v404_v1  ;;  %v53_v4 = vadd.s32 4, %v50_v3  ;;  %v69_v5 = vadd.s32 11, %v50_v3  ;;  %v61_v6 = vadd.s32 6, %v50_v3  ;;  %v78_v7 = vld [vmem:[#allocation2 + $0x8] sm:$0xff]  ;;  %v406_v8 = vmov 1   ;;  %v77_v9 = vld [vmem:[#allocation2] sm:$0xff] }
  0x1e   :  { %299 = vmatprep.subr.mxu0 %v405_v2  ;;  %306 = vmatprep.subr.mxu1 %v405_v2  ;;  %vm407_vm0 = vmmov 0   ;;  %v52_v11 = vand.u32 127, %v51_v10  ;;  %v49_v14 = vld [vmem:[%s460_s0] sm:$0xff]  ;;  %vm79_vm4 = vcmask 130048   ;;  %v195_v22 = vld [vmem:[#allocation5 + $0x18] sm:$0xff]  ;;  %v193_v24 = vld [vmem:[#allocation5 + $0x8] sm:$0xff] }
  0x1f   :  { %55 = vperm.xlu0 %327, %v53_v4   ;;  %71 = vperm.xlu1 %329, %v69_v5   ;;  %v194_v23 = vld [vmem:[#allocation5 + $0x10] sm:$0xff]  ;;  %v192_v25 = vld [vmem:[#allocation5] sm:$0xff]  ;;  %vm153_vm5 = vcmask 261120   ;;  %v182_v47 = vshrl.u32 %v51_v10, 7  ;;  %s408_s7 = smov [#allocation7]  }
  0x20   :  { %300 = vmatpush3.msra.mxu0 %v78_v7  ;;  %303 = vmatprep.mubr.msk.f32.mxu0 %vm407_vm0, %v405_v2  ;;  %v172_v48 = vld [vmem:[%s463_s3] sm:$0x3]  ;;  %s276_s8 = sshll.u32 %s408_s7, 4  ;;  %s277_s8 = int_to_ptr.vmem [resolvable:$true] %s276_s8 }
  0x21   :  { %301 = vmatprep.subr.mxu0 %v405_v2  ;;  %314 = vmatprep.mubr.msk.f32.mxu1 %vm407_vm0, %v405_v2  ;;  %v183_v51 = vsub.s32 0, %v182_v47  ;;  %v188_v55 = vsub.s32 1, %v182_v47  ;;  %s373_s3 = scalar_lea.vmem %s277_s8, 128  ;;  %p378_p11 = scmp.lt.s32.totalorder %s277_s8, %s277_s8 }
  0x22   :  { %302 = vmatpush3.msra.mxu0 %v77_v9  ;;  %307 = vmatpush3.msra.mxu1 %v195_v22  ;;  %p374_p10 = scmp.ne.s32.totalorder %s277_s8, %s373_s3  ;;  %p379_p12 = scmp.lt.s32.totalorder %s373_s3, %s373_s3 }
  0x23   :  { %328 = vset.pattern.permute.xlu0 %v406_v8  ;;  %308 = vmatprep.subr.mxu1 %v405_v2 }
  0x24   :  { %63 = vperm.xlu0 %328, %v61_v6   ;;  %309 = vmatpush3.msra.mxu1 %v194_v23  ;;  %p380_p13 = por %p379_p12, %p378_p11 }
  0x25   :  { %310 = vmatprep.subr.mxu1 %v405_v2 }
  0x26   :  { %311 = vmatpush3.msra.mxu1 %v193_v24  ;;  %p381_p0 = pnand %p380_p13, %p374_p10 }
  0x27   :  { %312 = vmatprep.subr.mxu1 %v405_v2 }
  0x28   :  { %330 = vset.pattern.permute.xlu0 %v404_v1  ;;  %313 = vmatpush3.msra.mxu1 %v192_v25 }
  0x9a   :  { %v56_v12 = vpop.permute.xlu0 %55  ;;  %v72_v13 = vpop.permute.xlu1 %71 }
  0x9b   :  { %vm57_vm1 = vcmp.eq.s32.totalorder %v52_v11, %v56_v12  ;;  %vm73_vm2 = vcmp.eq.s32.totalorder %v52_v11, %v72_v13 }
  0x9c   :  { %v286_v15 = vsel %vm57_vm1, 1.0, %v405_v2  ;;  %v288_v19 = vsel %vm73_vm2, 1.0, %v405_v2 }
  0x9d   :  { %v60_v17 = vadd.f32 %v286_v15, %v49_v14 }
  0x9f   :  { %v64_v16 = vpop.permute.xlu0 %63 }
  0xa0   :  { %vm65_vm3 = vcmp.eq.s32.totalorder %v52_v11, %v64_v16 }
  0xa1   :  { %v287_v18 = vsel %vm65_vm3, 1.0, %v405_v2 }
  0xa2   :  { %v68_v20 = vadd.f32 %v287_v18, %v60_v17 }
  0xa4   :  { %v76_v21 = vadd.f32 %v288_v19, %v68_v20 }
  0xa6   :  { %304 = vmatmul.mubr.msk.f32.vlgmr.msra.gmra.mxu0 %vm79_vm4, %v76_v21 }
 0x166   :  { %v149_v26 = vpop.f32.mrf.mxu0 }
 0x167   :  { %v154_v27 = vsel %vm153_vm5, %v149_v26, 0.0 }
 0x168   :  { %v155_v28 = vrot.slane %v154_v27, 4  ;;  %v305_v29 = vpop.f32.mrf.mxu0 }
 0x16a   :  { %v156_v30 = vadd.f32 %v155_v28, %v154_v27 }
 0x16c   :  { %v157_v31 = vrot.slane %v156_v30, 2 }
 0x16e   :  { %v158_v32 = vadd.f32 %v157_v31, %v156_v30 }
 0x170   :  { %v159_v33 = vrot.slane %v158_v32, 1 }
 0x172   :  { %v160_v34 = vadd.f32 %v159_v33, %v158_v32 }
 0x174   :  { %v161_v35 = vmul.f32 0.125, %v160_v34 }
 0x176   :  { %v162_v36 = vsub.f32 %v149_v26, %v161_v35 }
 0x178   :  { %v163_v37 = vmul.f32 %v162_v36, %v162_v36 }
 0x17a   :  { %v164_v38 = vsel %vm153_vm5, %v163_v37, 0.0 }
 0x17b   :  { %v165_v39 = vrot.slane %v164_v38, 4 }
 0x17d   :  { %v166_v40 = vadd.f32 %v165_v39, %v164_v38 }
 0x17f   :  { %v167_v41 = vrot.slane %v166_v40, 2 }
 0x181   :  { %v168_v42 = vadd.f32 %v167_v41, %v166_v40 }
 0x183   :  { %v169_v43 = vrot.slane %v168_v42, 1 }
 0x185   :  { %v170_v44 = vadd.f32 %v169_v43, %v168_v42 }
 0x187   :  { %v171_v45 = vmul.f32 0.125, %v170_v44 }
 0x189   :  { %v173_v46 = vadd.f32 1e-05, %v171_v45 }
 0x18b   :  { %331 = vrsqrt.f32 %v173_v46 }
 0x198   :  { %v332_v49 = vpop.eup %331 }
 0x199   :  { %v175_v50 = vmul.f32 %v332_v49, %v172_v48 }
 0x19b   :  { %v176_v52 = vmul.f32 %v175_v50, %v161_v35  ;;  %v184_v54 = vrot.slane %v175_v50, %v183_v51 }
 0x19d   :  { %v178_v53 = vrot.slane %v176_v52, 7  ;;  %v185_v57 = vmul.f32 %v184_v54, %v149_v26 }
 0x19f   :  { %v180_v56 = vsub.f32 %v172_v48, %v178_v53 }
 0x1a1   :  { %v189_v58 = vrot.slane %v180_v56, %v188_v55 }
 0x1a3   :  { %v190_v59 = vadd.f32 %v189_v58, %v185_v57 }
 0x1a5   :  { %v191_v60 = vmax.f32 %v190_v59, 0.0 }
 0x1a7   :  { %315 = vmatmul.mubr.msk.f32.vlgmr.msra.gmra.mxu1 %vm153_vm5, %v191_v60 }
 0x267   :  { %v265_v61 = vpop.f32.mrf.mxu1 }
 0x268   :  { %269 = vst [vmem:[#allocation7] sm:$0xff] %v265_v61 }
 0x269   :  { %v316_v62 = vpop.f32.mrf.mxu1 }
 0x26a   :  { %384 = shalt.err (!%p381_p0)
}
 0x26b   :  { %279 = dma.vmem_to_hbm [thread:$0]  %s277_s8, 128, %s465_s5, [#allocation4]  }
 0x26c   :  { %397 = dma.done.wait [#allocation4], 128  }
 0x26d   :  { %398 = vsyncadd [#allocation4], 4294967168 }
 0x26e   :  { %283 = vsyncpa [#allocation3], 1 }
 0x26f   :  { %284 = vsyncpa [#allocation6], 1 }
 0x270   :  { %285 = vsyncpa [#allocation4], 1 }

</bundles_post_ra>
